<compile_context>
chip_gen: v7x
topology: tpu7x:2x2x1
jax: 0.10.0
libtpu: 0.0.40
codegen_flags: <defaults>
</compile_context>

<pallas_src>
import functools

import jax
import jax.numpy as jnp
from jax.experimental import pallas as pl
from jax.experimental.pallas import tpu as pltpu

LANE = 128            # lane (fast) axis
SUB = 8               # f32 sublane tile
MAX_BLOCK_ROWS = 1024  # (1024,128) f32 block = 512 KiB; double-buffered y/y_/mask
                       # is ~2.3 MiB of VMEM -> safe on v5e/v6e/v7x.
NUM_SHARDS = 2         # "parallel" outer axis -> 2 TCs on v7x, harmless elsewhere.


def _boosted_mse_kernel(y_ref, yp_ref, m_ref, out_ref, acc_ref, *,
                        n_valid, block_rows, tiles_per_shard):
    s = pl.program_id(0)       # shard (TensorCore) index
    i = pl.program_id(1)       # tile index within the shard

    @pl.when(i == 0)
    def _init():
        acc_ref[...] = jnp.zeros_like(acc_ref)

    # Unclamped global tile index. The index_map clamps the DMA source into
    # range, so "extra" tiles past the end of the array re-read valid data;
    # the validity mask below zeroes their contribution.
    t = s * tiles_per_shard + i
    row0 = t * block_rows

    d = y_ref[...] - yp_ref[...]
    sq = d * d
    mt = m_ref[...].astype(jnp.float32)          # int8 -> f32 (cheap VPU cast)

    # Validity mask: covers lane-padding, ragged last block, and clamped
    # over-read tiles. jnp.where keeps any garbage (NaN/Inf) from propagating.
    row_iota = jax.lax.broadcasted_iota(jnp.int32, (block_rows, LANE), 0)
    lane_iota = jax.lax.broadcasted_iota(jnp.int32, (block_rows, LANE), 1)
    elem = (row0 + row_iota) * LANE + lane_iota
    valid = elem < n_valid

    sq = jnp.where(valid, sq, 0.0)
    mt = jnp.where(valid, mt, 0.0)

    def fold(x):  # (block_rows, 128) -> (8, 128): pure vreg adds, no XLU
        return x.reshape(block_rows // SUB, SUB, LANE).sum(axis=0)

    acc_ref[0] += fold(sq * mt)   # sum((y-y_)^2 over mask==True)
    acc_ref[1] += fold(sq)        # sum((y-y_)^2 over everything valid)
    acc_ref[2] += fold(mt)        # count of mask==True

    @pl.when(i == pl.num_programs(1) - 1)
    def _finalize():
        out_ref[0] = acc_ref[...]   # per-shard lanewise partial sums


def boosted_mse_loss(y, y_, letter_masks, c):
    # Flatten to a lane-dense (rows, 128) slab: the op is elementwise + global
    # reduction, so only lane density matters, not NCHW order.
    y = jnp.asarray(y, jnp.float32).reshape(-1)
    yp = jnp.asarray(y_, jnp.float32).reshape(-1)
    m = jnp.asarray(letter_masks, jnp.bool_).reshape(-1).astype(jnp.int8)

    n = y.shape[0]

    # Pad only when n is not already a multiple of 8*128 (the demo needs none).
    # Padded positions are excluded in-kernel via the iota validity mask.
    pad = (-n) % (SUB * LANE)
    if pad:
        y = jnp.pad(y, (0, pad))
        yp = jnp.pad(yp, (0, pad))
        m = jnp.pad(m, (0, pad))

    rows = (n + pad) // LANE
    y = y.reshape(rows, LANE)
    yp = yp.reshape(rows, LANE)
    m = m.reshape(rows, LANE)

    # Full-array block for small inputs, otherwise large fixed blocks.
    block_rows = rows if rows <= MAX_BLOCK_ROWS else MAX_BLOCK_ROWS
    total_tiles = pl.cdiv(rows, block_rows)
    tiles_per_shard = pl.cdiv(total_tiles, NUM_SHARDS)

    def in_map(s, i):
        # Clamp so over-allocated shard tiles stay in-bounds (masked in-kernel).
        return (jnp.minimum(s * tiles_per_shard + i, total_tiles - 1), 0)

    data_spec = pl.BlockSpec((block_rows, LANE), in_map)

    cost = pl.CostEstimate(
        flops=6 * n,
        transcendentals=0,
        bytes_accessed=(n + pad) * (4 + 4 + 1) + NUM_SHARDS * 3 * SUB * LANE * 4,
    )

    partials = pl.pallas_call(
        functools.partial(
            _boosted_mse_kernel,
            n_valid=n,
            block_rows=block_rows,
            tiles_per_shard=tiles_per_shard,
        ),
        out_shape=jax.ShapeDtypeStruct((NUM_SHARDS, 3, SUB, LANE), jnp.float32),
        grid_spec=pltpu.PrefetchScalarGridSpec(
            num_scalar_prefetch=0,
            grid=(NUM_SHARDS, tiles_per_shard),
            in_specs=[data_spec, data_spec, data_spec],
            out_specs=pl.BlockSpec((1, 3, SUB, LANE), lambda s, i: (s, 0, 0, 0)),
            scratch_shapes=[pltpu.VMEM((3, SUB, LANE), jnp.float32)],
        ),
        compiler_params=pltpu.CompilerParams(
            dimension_semantics=("parallel", "arbitrary")),
        cost_estimate=cost,
    )(y, yp, m)

    # Tiny epilogue over 2*3*8*128 floats: cross-lane/shard reduce + scalar
    # combine (kept in the literal PyTorch form so empty-subset -> NaN matches).
    sums = jnp.sum(partials, axis=(0, 2, 3))        # [sum_sq_t, sum_sq_all, n_t]
    sum_t, sum_all, n_t = sums[0], sums[1], sums[2]
    sum_f = sum_all - sum_t
    n_f = jnp.float32(n) - n_t
    loss_not_masked = sum_t / n_t
    loss_masked = sum_f / n_f
    return (n_t * loss_not_masked + c * n_f * loss_masked) / (n_t + c * n_f)


def _reference(y, y_, letter_masks, c):
    y = jnp.asarray(y, jnp.float32)
    yp = jnp.asarray(y_, jnp.float32)
    m = jnp.asarray(letter_masks, jnp.bool_)
    sq = (y - yp) ** 2
    n_t = jnp.sum(m).astype(jnp.float32)
    n_f = jnp.sum(~m).astype(jnp.float32)
    loss_t = jnp.sum(jnp.where(m, sq, 0.0)) / n_t
    loss_f = jnp.sum(jnp.where(~m, sq, 0.0)) / n_f
    return (n_t * loss_t + c * n_f * loss_f) / (n_t + c * n_f)


if __name__ == "__main__":
    key = jax.random.PRNGKey(0)
    k1, k2, k3 = jax.random.split(key, 3)

    B, C, H, W = 2, 4, 16, 16          # NCHW, as the PyTorch caller would pass
    y = jax.random.normal(k1, (B, C, H, W), jnp.float32)
    y_hat = jax.random.normal(k2, (B, C, H, W), jnp.float32)
    letter_masks = jax.random.bernoulli(k3, 0.6, (B, C, H, W))
    boost_c = 3.0                      # c > 1 boosts the hidden-mask term

    out = boosted_mse_loss(y, y_hat, letter_masks, boost_c)
    out = jax.block_until_ready(out)

    ref = _reference(y, y_hat, letter_masks, boost_c)
    assert jnp.allclose(out, ref, rtol=1e-5, atol=1e-6), (out, ref)

    print("KERNEL_OK")
</pallas_src>

<mosaic_0001>
module attributes {stable_mosaic.version = 11 : i64} {
  func.func @_boosted_mse_kernel(%arg0: i32, %arg1: i32, %arg2: memref<16x128xf32, #tpu.memory_space<vmem>>, %arg3: memref<16x128xf32, #tpu.memory_space<vmem>>, %arg4: memref<16x128xi8, #tpu.memory_space<vmem>>, %arg5: memref<1x3x8x128xf32, #tpu.memory_space<vmem>>, %arg6: memref<3x8x128xf32, #tpu.memory_space<vmem>>) attributes {dimension_semantics = [#tpu.dimension_semantics<parallel>, #tpu.dimension_semantics<arbitrary>], iteration_bounds = array<i64: 2, 1>, scalar_prefetch = 0 : i64, scratch_operands = 1 : i64, tpu.core_type = #tpu.core_type<tc>, window_params = [{transform_indices = @transform_0, window_bounds = array<i64: 16, 128>}, {transform_indices = @transform_1, window_bounds = array<i64: 16, 128>}, {transform_indices = @transform_2, window_bounds = array<i64: 16, 128>}, {transform_indices = @transform_3, window_bounds = array<i64: 1, 3, 8, 128>}]} {
    %c0_i32 = arith.constant 0 : i32
    %0 = arith.cmpi eq, %arg1, %c0_i32 : i32
    %1 = arith.extui %0 : i1 to i32
    %c0_i32_0 = arith.constant 0 : i32
    %2 = arith.cmpi ne, %1, %c0_i32_0 : i32
    scf.if %2 {
      %cst_28 = arith.constant 0.000000e+00 : f32
      %53 = vector.broadcast %cst_28 : f32 to vector<3x8x128xf32>
      %c0_29 = arith.constant 0 : index
      %c0_30 = arith.constant 0 : index
      %c0_31 = arith.constant 0 : index
      %54 = vector.load %arg6[%c0_29, %c0_30, %c0_31] : memref<3x8x128xf32, #tpu.memory_space<vmem>>, vector<3x8x128xf32>
      tpu.vector_store %arg6[%c0_29, %c0_30, %c0_31], %53 {strides = array<i32>} : memref<3x8x128xf32, #tpu.memory_space<vmem>>, vector<3x8x128xf32>,
    } else {
    }
    %c1_i32 = arith.constant 1 : i32
    %3 = arith.muli %arg0, %c1_i32 : i32
    %4 = arith.addi %3, %arg1 : i32
    %c16_i32 = arith.constant 16 : i32
    %5 = arith.muli %4, %c16_i32 : i32
    %c0 = arith.constant 0 : index
    %c0_1 = arith.constant 0 : index
    %6 = vector.load %arg2[%c0, %c0_1] : memref<16x128xf32, #tpu.memory_space<vmem>>, vector<16x128xf32>
    %c0_2 = arith.constant 0 : index
    %c0_3 = arith.constant 0 : index
    %7 = vector.load %arg3[%c0_2, %c0_3] : memref<16x128xf32, #tpu.memory_space<vmem>>, vector<16x128xf32>
    %8 = arith.subf %6, %7 : vector<16x128xf32>
    %9 = arith.mulf %8, %8 : vector<16x128xf32>
    %c0_4 = arith.constant 0 : index
    %c0_5 = arith.constant 0 : index
    %10 = vector.load %arg4[%c0_4, %c0_5] : memref<16x128xi8, #tpu.memory_space<vmem>>, vector<16x128xi8>
    %11 = arith.sitofp %10 : vector<16x128xi8> to vector<16x128xf32>
    %12 = tpu.iota {dimensions = array<i32: 0>} : vector<16x128xi32>
    %13 = tpu.iota {dimensions = array<i32: 1>} : vector<16x128xi32>
    %14 = vector.broadcast %5 : i32 to vector<16x128xi32>
    %15 = arith.addi %14, %12 : vector<16x128xi32>
    %c128_i32 = arith.constant 128 : i32
    %16 = vector.broadcast %c128_i32 : i32 to vector<16x128xi32>
    %17 = arith.muli %15, %16 : vector<16x128xi32>
    %18 = arith.addi %17, %13 : vector<16x128xi32>
    %c2048_i32 = arith.constant 2048 : i32
    %19 = vector.broadcast %c2048_i32 : i32 to vector<16x128xi32>
    %20 = arith.cmpi slt, %18, %19 : vector<16x128xi32>
    %cst = arith.constant 0.000000e+00 : f32
    %21 = vector.broadcast %cst : f32 to vector<16x128xf32>
    %22 = arith.select %20, %9, %21 : vector<16x128xi1>, vector<16x128xf32>
    %cst_6 = arith.constant 0.000000e+00 : f32
    %23 = vector.broadcast %cst_6 : f32 to vector<16x128xf32>
    %24 = arith.select %20, %11, %23 : vector<16x128xi1>, vector<16x128xf32>
    %c0_7 = arith.constant 0 : index
    %c0_8 = arith.constant 0 : index
    %c0_9 = arith.constant 0 : index
    %25 = vector.load %arg6[%c0_7, %c0_8, %c0_9] : memref<3x8x128xf32, #tpu.memory_space<vmem>>, vector<1x8x128xf32>
    %26 = vector.shape_cast %25 : vector<1x8x128xf32> to vector<8x128xf32>
    %27 = arith.mulf %22, %24 : vector<16x128xf32>
    %28 = vector.shape_cast %27 : vector<16x128xf32> to vector<2x8x128xf32>
    %cst_10 = arith.constant dense<0.000000e+00> : vector<8x128xf32>
    %29 = vector.multi_reduction <add>, %28, %cst_10 [0] : vector<2x8x128xf32> to vector<8x128xf32>
    %30 = arith.addf %26, %29 : vector<8x128xf32>
    %c0_11 = arith.constant 0 : index
    %c0_12 = arith.constant 0 : index
    %c0_13 = arith.constant 0 : index
    %31 = vector.load %arg6[%c0_11, %c0_12, %c0_13] : memref<3x8x128xf32, #tpu.memory_space<vmem>>, vector<1x8x128xf32>
    %32 = vector.shape_cast %31 : vector<1x8x128xf32> to vector<8x128xf32>
    %33 = vector.shape_cast %30 : vector<8x128xf32> to vector<1x8x128xf32>
    tpu.vector_store %arg6[%c0_11, %c0_12, %c0_13], %33 {strides = array<i32>} : memref<3x8x128xf32, #tpu.memory_space<vmem>>, vector<1x8x128xf32>,
    %c1 = arith.constant 1 : index
    %c0_14 = arith.constant 0 : index
    %c0_15 = arith.constant 0 : index
    %34 = vector.load %arg6[%c1, %c0_14, %c0_15] : memref<3x8x128xf32, #tpu.memory_space<vmem>>, vector<1x8x128xf32>
    %35 = vector.shape_cast %34 : vector<1x8x128xf32> to vector<8x128xf32>
    %36 = vector.shape_cast %22 : vector<16x128xf32> to vector<2x8x128xf32>
    %cst_16 = arith.constant dense<0.000000e+00> : vector<8x128xf32>
    %37 = vector.multi_reduction <add>, %36, %cst_16 [0] : vector<2x8x128xf32> to vector<8x128xf32>
    %38 = arith.addf %35, %37 : vector<8x128xf32>
    %c1_17 = arith.constant 1 : index
    %c0_18 = arith.constant 0 : index
    %c0_19 = arith.constant 0 : index
    %39 = vector.load %arg6[%c1_17, %c0_18, %c0_19] : memref<3x8x128xf32, #tpu.memory_space<vmem>>, vector<1x8x128xf32>
    %40 = vector.shape_cast %39 : vector<1x8x128xf32> to vector<8x128xf32>
    %41 = vector.shape_cast %38 : vector<8x128xf32> to vector<1x8x128xf32>
    tpu.vector_store %arg6[%c1_17, %c0_18, %c0_19], %41 {strides = array<i32>} : memref<3x8x128xf32, #tpu.memory_space<vmem>>, vector<1x8x128xf32>,
    %c2 = arith.constant 2 : index
    %c0_20 = arith.constant 0 : index
    %c0_21 = arith.constant 0 : index
    %42 = vector.load %arg6[%c2, %c0_20, %c0_21] : memref<3x8x128xf32, #tpu.memory_space<vmem>>, vector<1x8x128xf32>
    %43 = vector.shape_cast %42 : vector<1x8x128xf32> to vector<8x128xf32>
    %44 = vector.shape_cast %24 : vector<16x128xf32> to vector<2x8x128xf32>
    %cst_22 = arith.constant dense<0.000000e+00> : vector<8x128xf32>
    %45 = vector.multi_reduction <add>, %44, %cst_22 [0] : vector<2x8x128xf32> to vector<8x128xf32>
    %46 = arith.addf %43, %45 : vector<8x128xf32>
    %c2_23 = arith.constant 2 : index
    %c0_24 = arith.constant 0 : index
    %c0_25 = arith.constant 0 : index
    %47 = vector.load %arg6[%c2_23, %c0_24, %c0_25] : memref<3x8x128xf32, #tpu.memory_space<vmem>>, vector<1x8x128xf32>
    %48 = vector.shape_cast %47 : vector<1x8x128xf32> to vector<8x128xf32>
    %49 = vector.shape_cast %46 : vector<8x128xf32> to vector<1x8x128xf32>
    tpu.vector_store %arg6[%c2_23, %c0_24, %c0_25], %49 {strides = array<i32>} : memref<3x8x128xf32, #tpu.memory_space<vmem>>, vector<1x8x128xf32>,
    %c0_i32_26 = arith.constant 0 : i32
    %50 = arith.cmpi eq, %arg1, %c0_i32_26 : i32
    %51 = arith.extui %50 : i1 to i32
    %c0_i32_27 = arith.constant 0 : i32
    %52 = arith.cmpi ne, %51, %c0_i32_27 : i32
    scf.if %52 {
      %c0_28 = arith.constant 0 : index
      %c0_29 = arith.constant 0 : index
      %c0_30 = arith.constant 0 : index
      %53 = vector.load %arg6[%c0_28, %c0_29, %c0_30] : memref<3x8x128xf32, #tpu.memory_space<vmem>>, vector<3x8x128xf32>
      %c0_31 = arith.constant 0 : index
      %c0_32 = arith.constant 0 : index
      %c0_33 = arith.constant 0 : index
      %c0_34 = arith.constant 0 : index
      %54 = vector.load %arg5[%c0_31, %c0_32, %c0_33, %c0_34] : memref<1x3x8x128xf32, #tpu.memory_space<vmem>>, vector<1x3x8x128xf32>
      %55 = vector.shape_cast %54 : vector<1x3x8x128xf32> to vector<3x8x128xf32>
      %56 = vector.shape_cast %53 : vector<3x8x128xf32> to vector<1x3x8x128xf32>
      tpu.vector_store %arg5[%c0_31, %c0_32, %c0_33, %c0_34], %56 {strides = array<i32>} : memref<1x3x8x128xf32, #tpu.memory_space<vmem>>, vector<1x3x8x128xf32>,
    } else {
    }
    return
  }
  func.func @transform_0(%arg0: i32, %arg1: i32) -> (i32, i32) {
    %c1_i32 = arith.constant 1 : i32
    %0 = arith.muli %arg0, %c1_i32 : i32
    %1 = arith.addi %0, %arg1 : i32
    %c0_i32 = arith.constant 0 : i32
    %2 = arith.minsi %1, %c0_i32 : i32
    %c0_i32_0 = arith.constant 0 : i32
    %c0_i32_1 = arith.constant 0 : i32
    return %2, %c0_i32_0 : i32, i32
  }
  func.func @transform_1(%arg0: i32, %arg1: i32) -> (i32, i32) {
    %c1_i32 = arith.constant 1 : i32
    %0 = arith.muli %arg0, %c1_i32 : i32
    %1 = arith.addi %0, %arg1 : i32
    %c0_i32 = arith.constant 0 : i32
    %2 = arith.minsi %1, %c0_i32 : i32
    %c0_i32_0 = arith.constant 0 : i32
    %c0_i32_1 = arith.constant 0 : i32
    return %2, %c0_i32_0 : i32, i32
  }
  func.func @transform_2(%arg0: i32, %arg1: i32) -> (i32, i32) {
    %c1_i32 = arith.constant 1 : i32
    %0 = arith.muli %arg0, %c1_i32 : i32
    %1 = arith.addi %0, %arg1 : i32
    %c0_i32 = arith.constant 0 : i32
    %2 = arith.minsi %1, %c0_i32 : i32
    %c0_i32_0 = arith.constant 0 : i32
    %c0_i32_1 = arith.constant 0 : i32
    return %2, %c0_i32_0 : i32, i32
  }
  func.func @transform_3(%arg0: i32, %arg1: i32) -> (i32, i32, i32, i32) {
    %c0_i32 = arith.constant 0 : i32
    %c0_i32_0 = arith.constant 0 : i32
    %c0_i32_1 = arith.constant 0 : i32
    %c0_i32_2 = arith.constant 0 : i32
    return %arg0, %c0_i32, %c0_i32_0, %c0_i32_1 : i32, i32, i32, i32
  }
}

</mosaic_0001>

<bundles_post_ra>
// kernel: tpu_custom_call.1
= control target key start
LH: loop header
LB: loop body
LE: loop exit
PB: predicated region body
PF: predicated region fallthrough
CT: control target
= control target key end

     0   :  { %8 = vsyncpa [#allocation4], 0  ;;  %s1040_s0 = inlined_call_operand.hbm [shape: f32[16,128], index: 0, kind: input, shape index: {}]   ;;  %s1041_s1 = inlined_call_operand.hbm [shape: f32[16,128], index: 1, kind: input, shape index: {}]   ;;  %s1042_s2 = inlined_call_operand.vmem [shape: s8[16,128], index: 2, kind: input, shape index: {}]   ;;  %s1043_s3 = inlined_call_operand.hbm [shape: f32[2,3,8,128], index: 3, kind: output, shape index: {}]  }
   0x1   :  { %10 = vsyncpa [#allocation4 + $0x1], 0 }
   0x2   :  { %11 = vsyncpa [#allocation7], 0 }
   0x3   :  { %13 = vsyncpa [#allocation7 + $0x1], 0 }
   0x4   :  { %14 = vsyncpa [#allocation5], 0 }
   0x5   :  { %16 = vsyncpa [#allocation5 + $0x1], 0  ;;  %s824_s12 = smov 0   ;;  %s826_s13 = smov 0  }
   0x6   :  { %s828_s14 = smov 0   ;;  %s830_s15 = smov 0  }
   0x7   :  { %s832_s16 = smov 0   ;;  %s834_s17 = smov 0  }
   0x8   :  { %s836_s18 = smov 0   ;;  %s838_s19 = smov 0  }
   0x9 LB: > { %s506_s20 = sadd.s32 4294967295, %s795_s19   ;;  %s507_s21 = sadd.s32 4294967294, %s795_s19   ;;  %s795_s19 = sphi %s838_s19, %s22_s19   ;;  %s791_s18 = sphi %s836_s18, %s1062_s18   ;;  %s787_s17 = sphi %s834_s17, %s1061_s17   ;;  %s783_s16 = sphi %s832_s16, %s1030_s16   ;;  %s779_s15 = sphi %s830_s15, %s1060_s15   ;;  %s775_s14 = sphi %s828_s14, %s1059_s14   ;;  %s771_s13 = sphi %s826_s13, %s1058_s13   ;;  %s767_s12 = sphi %s824_s12, %s1057_s12  }
   0xa   : > { %s34_s22 = sadd.s32 1, %s791_s18  ;;  %p764_p1 = scmp.ne.s32.totalorder %s783_s16, 0 }
   0xb   : > { %p36_p0 = scmp.ge.s32.totalorder %s34_s22, 2  ;;  %p55_p2 = scmp.eq.s32.totalorder %s795_s19, 0 }
   0xc   : > { %p60_p3 = scmp.ne.s32.totalorder %s783_s16, %s779_s15  ;;  %p61_p5 = scmp.eq.s32.totalorder %s506_s20, 0 }
   0xd   : > { %s1064_s22 = smov (%p36_p0, %s34_s22), 0  ;;  %p870_p4 = por %p764_p1, %p55_p2 }
   0xe   : > { %p874_p6 = por %p61_p5, %p60_p3  ;;  %s134_s25 = ssub.s32 %s791_s18, %s1064_s22 }
   0xf   : > { %p135_p7 = scmp.eq.s32.totalorder %s134_s25, 0  ;;  %s137_s26 = sadd.s32 1, %s775_s14 }
  0x10   : > { %s1047_s24 = scalar_select %p874_p6, 1, 0 }
  0x11   : > { %s882_s27 = scalar_select %p135_p7, %s775_s14, %s137_s26  }
  0x12   : > { %p147_p8 = scmp.ne.s32.totalorder %s775_s14, %s771_s13  ;;  %p148_p9 = scmp.eq.s32.totalorder %s506_s20, 1 }
  0x13   : > { %p153_p10 = scmp.ne.s32.totalorder %s771_s13, %s767_s12  ;;  %p154_p11 = scmp.eq.s32.totalorder %s507_s21, 1 }
  0x14   : > { %p888_p12 = por %p148_p9, %p147_p8  ;;  %p550_p1 = scmp.lt.s32.totalorder %s795_s19, 2 }
  0x15   : > { %p893_p0 = por %p154_p11, %p153_p10  ;;  %s797_s30 = smov [#allocation3]  }
  0x16   : > { %s1048_s28 = scalar_select %p888_p12, 1, 0 }
  0x17   : > { %s1049_s29 = scalar_select %p893_p0, 1, 0 }
  0x18   : > { %s188_s4 = sshll.u32 %s797_s30, 4  ;;  %p900_p2 = pnand %p550_p1, %p870_p4  ;;  %s189_s4 = int_to_ptr.vmem [resolvable:$true] %s188_s4 }
  0x19   : > { %s628_s8 = scalar_lea.hbm %s1040_s0, 256 }
  0x1a   : > { %p629_p3 = scmp.ne.s32.totalorder %s1040_s0, %s628_s8  ;;  %p630_p5 = pneg %p900_p2 }
  0x1b   : > { %p635_p8 = scmp.lt.u32.totalorder %s628_s8, %s628_s8  ;;  %p637_p9 = scmp.lt.u32.totalorder %s628_s8, %s1040_s0 }
  0x1c   : > { %p631_p7 = pnand %p630_p5, %p629_p3 }
  0x1d   : > { %p638_p10 = por %p637_p9, %p635_p8 }
  0x1e   : > { %p632_p4 = pneg %p631_p7 }
  0x20   : > { %p639_p11 = pnand %p638_p10, %p632_p4 }
  0x22   : > { %642 = shalt.err (!%p639_p11)
}
  0x23   : > { %s643_s20 = scalar_lea.vmem %s189_s4, 256  ;;  %s650_s21 = scalar_lea.vmem %s189_s4, 512 }
  0x24   : > { %p644_p1 = scmp.ne.s32.totalorder %s189_s4, %s643_s20  ;;  %p651_p12 = scmp.lt.s32.totalorder %s189_s4, %s189_s4 }
  0x25   : > { %p652_p6 = scmp.lt.s32.totalorder %s650_s21, %s643_s20 }
  0x26   : > { %p646_p13 = pnand %p644_p1, %p630_p5 }
  0x27   : > { %p653_p3 = por %p652_p6, %p651_p12 }
  0x28   : > { %p647_p0 = pneg %p646_p13 }
  0x2a   : > { %p654_p7 = pnand %p653_p3, %p647_p0 }
  0x2c   : > { %657 = shalt.err (!%p654_p7)
}
  0x2d   : > { %s798_s23 = smov 128   ;;  %s799_s25 = smov 8  }
  0x2e   : > { %542 = dma.hbm_to_vmem [thread:$0]  (!%p900_p2), %s1040_s0, 256, %s189_s4, [#allocation4], %s798_s23, %s798_s23, %s799_s25  }
  0x2f   : > { %p516_p13 = scmp.ge.s32.totalorder %s795_s19, 1  ;;  %p235_p4 = scmp.lt.s32.totalorder %s795_s19, 3 }
  0x30   : > { %s800_s7 = smov [#allocation6]   ;;  %s658_s11 = scalar_lea.hbm %s1041_s1, 256 }
  0x31   : > { %p931_p8 = pnand %p516_p13, %p235_p4  ;;  %s212_s8 = sshll.u32 %s800_s7, 4  ;;  %s213_s8 = int_to_ptr.vmem [resolvable:$true] %s212_s8 }
  0x32   : > { %p659_p6 = scmp.ne.s32.totalorder %s1041_s1, %s658_s11  ;;  %p665_p9 = scmp.lt.u32.totalorder %s658_s11, %s658_s11 }
  0x33   : > { %s1051_s6 = scalar_select %p931_p8, 1, 0 }
  0x34   : > { %p661_p12 = pnand %p659_p6, %p630_p5  ;;  %p667_p10 = scmp.lt.u32.totalorder %s658_s11, %s1041_s1 }
  0x36   : > { %p662_p0 = pneg %p661_p12  ;;  %p668_p11 = por %p667_p10, %p665_p9 }
  0x38   : > { %p669_p1 = pnand %p668_p11, %p662_p0 }
  0x3a   : > { %672 = shalt.err (!%p669_p1)
}
  0x3b   : > { %s673_s26 = scalar_lea.vmem %s213_s8, 256  ;;  %s680_s30 = scalar_lea.vmem %s213_s8, 512 }
  0x3c   : > { %p674_p3 = scmp.ne.s32.totalorder %s213_s8, %s673_s26  ;;  %p681_p4 = scmp.lt.s32.totalorder %s213_s8, %s213_s8 }
  0x3d   : > { %p682_p8 = scmp.lt.s32.totalorder %s680_s30, %s673_s26 }
  0x3e   : > { %p676_p7 = pnand %p674_p3, %p630_p5 }
  0x3f   : > { %p683_p6 = por %p682_p8, %p681_p4 }
  0x40   : > { %p677_p13 = pneg %p676_p7 }
  0x42   : > { %p684_p12 = pnand %p683_p6, %p677_p13 }
  0x44   : > { %687 = shalt.err (!%p684_p12)
}
  0x45   : > { %545 = dma.hbm_to_vmem [thread:$0]  (!%p900_p2), %s1041_s1, 256, %s213_s8, [#allocation7], %s798_s23, %s798_s23, %s799_s25  }
  0x46   : > { %p1052_p0 = scmp.ne.s32.totalorder %s1051_s6, 0 }
  0x47   : > { %s241_s10 = sand.u32 (!%p1052_p0), 1, %s783_s16   ;;  %p1053_p5 = scmp.ne.s32.totalorder (!%p1052_p0), %s1047_s24, 0 }
  0x48   : > { %239 = sbr.rel (%p1052_p0) target bundleno = 117 (0x75), region = 32  ;;  %s517_s11 = sshll.u32 (!%p1052_p0), %s241_s10, 4 }
  0x49   : > { %s242_s15 = scalar_lea.sflag (!%p1052_p0), [#allocation4], %s241_s10  ;;  %s245_s20 = scalar_lea.vmem (!%p1052_p0), [#allocation3], %s517_s11 }
  0x4f   : > { %753 = dma.done.wait (%p1053_p5), %s242_s15, 256  }
  0x50   : > { %755 = vsyncadd (%p1053_p5), %s242_s15, 4294967040  ;;  %s251_s5 = scalar_lea.sflag [#allocation7], %s241_s10  ;;  %s254_s4 = scalar_lea.vmem [#allocation6], %s517_s11 }
  0x51   : > { %757 = dma.done.wait (%p1053_p5), %s251_s5, 256  }
  0x52   : > { %759 = vsyncadd (%p1053_p5), %s251_s5, 4294967040  ;;  %p299_p2 = scmp.lt.s32.totalorder %s787_s17, 0  ;;  %v333_v0 = vlaneseq  ;;  %s521_s23 = sshll.u32 %s787_s17, 4  ;;  %v319_v8 = vld [vmem:[%s245_s20] sm:$0xff]  ;;  %v320_v9 = vld [vmem:[%s245_s20 + $0x8] sm:$0xff] }
  0x53   : > { %v338_v2 = vstv %s521_s23  ;;  %s287_s8 = sand.u32 1, %s771_s13   ;;  %v321_v10 = vld [vmem:[%s254_s4] sm:$0xff]  ;;  %v322_v11 = vld [vmem:[%s254_s4 + $0x8] sm:$0xff]  ;;  %s532_s11 = smul.u32 384, %s787_s17 }
  0x54   : > { %s300_s25 = scalar_select %p299_p2, %s787_s17, 0  ;;  %v334_v1 = vshrl.u32 %v333_v0, 7  ;;  %v337_v4 = vand.u32 127, %v333_v0  ;;  %v323_v12 = vsub.f32 %v319_v8, %v321_v10  ;;  %v324_v15 = vsub.f32 %v320_v9, %v322_v11 }
  0x55   : > { %s531_s24 = smul.u32 24, %s287_s8  ;;  %s984_s5 = scalar_lea.hbm %s1043_s3, %s532_s11 }
  0x56   : > { %s519_s6 = sshll.u32 %s300_s25, 1  ;;  %v335_v3 = vadd.s32 8, %v334_v1  ;;  %v339_v5 = vadd.s32 %v338_v2, %v334_v1  ;;  %v325_v16 = vmul.f32 %v323_v12, %v323_v12  ;;  %v326_v18 = vmul.f32 %v324_v15, %v324_v15  ;;  %s988_s17 = scalar_lea.sflag [#allocation5], %s287_s8 }
  0x57   : > { %p302_p8 = scmp.lt.s32.totalorder %s519_s6, 1  ;;  %s289_s9 = scalar_lea.vmem [#allocation8], %s531_s24 }
  0x58   : > { %v340_v6 = vadd.s32 %v338_v2, %v335_v3  ;;  %v341_v7 = vmul.u32 128, %v339_v5  ;;  %s390_s10 = sshll.u32 %s289_s9, 4  ;;  %p1054_p10 = scmp.ne.s32.totalorder %s1048_s28, 0  ;;  %s979_s10 = int_to_ptr.vmem [resolvable:$true] %s390_s10 }
  0x59   : > { %s1066_s6 = smov (!%p302_p8, %s519_s6), 1  ;;  %s688_s4 = scalar_lea.vmem %s979_s10, 384 }
  0x5a   : > { %v342_v13 = vmul.u32 128, %v340_v6  ;;  %v343_v14 = vadd.s32 %v341_v7, %v337_v4  ;;  %s520_s21 = sshll.u32 %s1066_s6, 1  ;;  %p689_p9 = scmp.ne.s32.totalorder %s979_s10, %s688_s4 }
  0x5b   : > { %s305_s7 = scalar_lea.vmem %s1042_s2, %s520_s21  ;;  %s801_s23 = smov [#allocation8]  }
  0x5c   : > { %v344_v17 = vadd.s32 %v342_v13, %v337_v4  ;;  %vm345_vm0 = vcmp.lt.s32.totalorder %v343_v14, 2048  ;;  %v528_v19 = vld [vmem:[%s305_s7] sm:$0xf]   ;;  %p690_p11 = pnand %p689_p9, %p1054_p10  ;;  %s692_s25 = sshll.u32 %s801_s23, 4  ;;  %s693_s25 = int_to_ptr.vmem [resolvable:$false] %s692_s25 }
  0x5d   : > { %v529_v20 = vunpack.c.0.s8 %v528_v19  ;;  %v530_v21 = vunpack.c.1.s8 %v528_v19  ;;  %v347_v22 = vsel %vm345_vm0, %v325_v16, 0.0  ;;  %s694_s6 = scalar_lea.vmem %s693_s25, 768  ;;  %p695_p3 = scmp.lt.s32.totalorder %s979_s10, %s693_s25 }
  0x5e   : > { %vm346_vm1 = vcmp.lt.s32.totalorder %v344_v17, 2048  ;;  %p691_p1 = pneg %p690_p11  ;;  %p696_p7 = scmp.lt.s32.totalorder %s694_s6, %s688_s4 }
  0x5f   : > { %v348_v23 = vsel %vm346_vm1, %v326_v18, 0.0  ;;  %v331_v24 = vcvt.s32.f32 %v529_v20  ;;  %v332_v25 = vcvt.s32.f32 %v530_v21 }
  0x60   : > { %v359_v26 = vadd.f32 %v348_v23, %v347_v22  ;;  %p697_p13 = por %p696_p7, %p695_p3 }
  0x61   : > { %v349_v27 = vsel %vm345_vm0, %v331_v24, 0.0  ;;  %v350_v28 = vsel %vm346_vm1, %v332_v25, 0.0 }
  0x62   : > { %374 = vst [vmem:[%s289_s9 + $0x8] sm:$0xff] %v359_v26  ;;  %v352_v29 = vmul.f32 %v349_v27, %v347_v22  ;;  %v353_v30 = vmul.f32 %v350_v28, %v348_v23  ;;  %v364_v31 = vadd.f32 %v350_v28, %v349_v27  ;;  %p698_p4 = pnand %p697_p13, %p691_p1 }
  0x64   : > { %v354_v32 = vadd.f32 %v353_v30, %v352_v29  ;;  %375 = vst [vmem:[%s289_s9 + $0x10] sm:$0xff] %v364_v31 }
  0x66   : > { %373 = vst [vmem:[%s289_s9] sm:$0xff] %v354_v32 }
  0x67   : > { %701 = shalt.err (!%p698_p4)
}
  0x68   : > { %s702_s8 = scalar_lea.hbm %s984_s5, 384  ;;  %s706_s26 = scalar_lea.hbm %s1043_s3, 768 }
  0x69   : > { %p703_p6 = scmp.ne.s32.totalorder %s984_s5, %s702_s8  ;;  %p707_p5 = scmp.lt.u32.totalorder %s984_s5, %s1043_s3 }
  0x6a   : > { %p708_p2 = scmp.lt.u32.totalorder %s706_s26, %s702_s8  ;;  %p710_p9 = scmp.lt.u32.totalorder %s702_s8, %s984_s5 }
  0x6b   : > { %p704_p12 = pnand %p703_p6, %p1054_p10 }
  0x6c   : > { %p709_p8 = por %p708_p2, %p707_p5 }
  0x6d   : > { %p705_p0 = pneg %p704_p12 }
  0x6e   : > { %p711_p11 = por %p710_p9, %p709_p8 }
  0x70   : > { %p712_p1 = pnand %p711_p11, %p705_p0 }
  0x72   : > { %715 = shalt.err (!%p712_p1)
}
  0x73   : > { %s802_s9 = smov 128   ;;  %s803_s11 = smov 8  }
  0x74   : > { %537 = dma.vmem_to_hbm [thread:$0]  (%p1054_p10), %s979_s10, 384, %s984_s5, %s988_s17, %s802_s9, %s802_s9, %s803_s11  }
  0x75 PF: > { %s405_s15 = sand.u32 1, %s767_s12   ;;  %p1055_p3 = scmp.ne.s32.totalorder %s1049_s29, 0 }
  0x76   : > { %p1056_p7 = scmp.ge.s32.totalorder %s795_s19, 2  ;;  %s406_s20 = scalar_lea.sflag [#allocation5], %s405_s15 }
  0x78   : > { %p547_p13 = pnand %p1056_p7, %p1055_p3 }
  0x7a   : > { %761 = dma.done.wait (!%p547_p13), %s406_s20, 384  }
  0x7b   : > { %763 = vsyncadd (!%p547_p13), %s406_s20, 4294966912  ;;  %s22_s19 = sadd.s32 1, %s795_s19   ;;  %s1057_s12 = smov %s771_s13 }
  0x7c   : > { %p19_p4 = scmp.ge.s32.totalorder %s22_s19, 4   ;;  %s1058_s13 = smov %s775_s14 }
  0x7d   : > { %s1059_s14 = smov %s882_s27  ;;  %s1060_s15 = smov %s783_s16 }
  0x7e   : > { %s1030_s16 = smov 0   ;;  %s1061_s17 = smov %s791_s18 }
  0x7f   : > { %s1062_s18 = smov %s1064_s22  ;;  %21 = sbr.rel (!%p19_p4) target bundleno = 9 (0x9), region = 103 }
  0x86   :  { %411 = vsyncpa [#allocation4], 1 }
  0x87   :  { %413 = vsyncpa [#allocation4 + $0x1], 1 }
  0x88   :  { %414 = vsyncpa [#allocation7], 1 }
  0x89   :  { %416 = vsyncpa [#allocation7 + $0x1], 1 }
  0x8a   :  { %417 = vsyncpa [#allocation5], 1 }
  0x8b   :  { %419 = vsyncpa [#allocation5 + $0x1], 1 }

</bundles_post_ra>
